<compile_context>
chip_gen: v7x
topology: tpu7x:2x2x1
jax: 0.10.0
libtpu: 0.0.40
codegen_flags: <defaults>
</compile_context>

<pallas_src>
import functools

import jax
import jax.numpy as jnp
from jax.experimental import pallas as pl
from jax.experimental.pallas import tpu as pltpu

_LANE = 128


def _round_up(v, m):
    return ((v + m - 1) // m) * m


def _mlp_kernel(*refs, slope, num_weights, compute_dtype):
    """Fused MLP forward for one batch tile.

    refs = (x_ref, w_0, ..., w_{num_weights-1}, out_ref).
    Every weight except the last is followed by LeakyReLU(slope).
    """
    x_ref = refs[0]
    w_refs = refs[1:1 + num_weights]
    o_ref = refs[-1]

    h = x_ref[...]                       # stays in input dtype for the MXU
    for i, w_ref in enumerate(w_refs):
        acc = jnp.dot(h, w_ref[...], preferred_element_type=jnp.float32)
        if i < num_weights - 1:
            # LeakyReLU in f32 (accumulator dtype): one vmul + one vmax.
            acc = jnp.maximum(acc, slope * acc)
            h = acc.astype(compute_dtype)   # keep next matmul in fast dtype
        else:
            h = acc
    o_ref[...] = h.astype(o_ref.dtype)


def mlp_forward(x, weights, leaky_relu_slope=0.2, block_batch=256):
    """Run the fused Pallas MLP.

    x:        [batch, input_dim]
    weights:  list of arrays, weights[i] has shape [in_i, out_i]
              (last one maps hidden_dim -> output_dim, no activation after it)
    """
    num_weights = len(weights)
    batch, in_dim = x.shape
    out_dim = weights[-1].shape[1]
    dtype = x.dtype
    itemsize = jnp.dtype(dtype).itemsize

    # ---- pad feature dims to lane-dense multiples of 128 -------------------
    in_p = _round_up(in_dim, _LANE)
    out_p = _round_up(out_dim, _LANE)
    padded_weights = []
    for w in weights:
        fi, fo = w.shape
        fi_p, fo_p = _round_up(fi, _LANE), _round_up(fo, _LANE)
        if (fi_p, fo_p) != (fi, fo):
            w = jnp.zeros((fi_p, fo_p), dtype=w.dtype).at[:fi, :fo].set(w)
        padded_weights.append(w)

    # ---- batch tiling -------------------------------------------------------
    sub = 16 if dtype in (jnp.bfloat16, jnp.float16) else 8
    tb = min(block_batch, _round_up(batch, sub))
    tb = _round_up(tb, sub)
    batch_p = _round_up(batch, tb)
    if (batch_p, in_p) != (batch, in_dim):
        x_pad = jnp.zeros((batch_p, in_p), dtype=dtype).at[:batch, :in_dim].set(x)
    else:
        x_pad = x
    grid = (pl.cdiv(batch_p, tb),)

    # ---- specs --------------------------------------------------------------
    in_specs = [pl.BlockSpec((tb, in_p), lambda i: (i, 0))]
    for w in padded_weights:
        # constant index_map: weight DMA'd once, stays VMEM-resident.
        in_specs.append(pl.BlockSpec(w.shape, lambda i: (0, 0)))
    out_specs = pl.BlockSpec((tb, out_p), lambda i: (i, 0))

    # ---- cost estimate (helps XLA schedule around the custom call) ----------
    flops = 2 * batch_p * sum(int(w.shape[0]) * int(w.shape[1])
                              for w in padded_weights)
    bytes_accessed = (x_pad.size * itemsize
                      + sum(w.size * jnp.dtype(w.dtype).itemsize
                            for w in padded_weights)
                      + batch_p * out_p * itemsize)
    cost = pl.CostEstimate(flops=flops, transcendentals=0,
                           bytes_accessed=bytes_accessed)

    # ---- VMEM budget (weights resident + double-buffered x/out + f32 work) --
    max_feat = max([in_p, out_p] + [int(w.shape[1]) for w in padded_weights])
    vmem_est = (2 * tb * (in_p + out_p) * itemsize
                + sum(w.size * jnp.dtype(w.dtype).itemsize
                      for w in padded_weights)
                + 2 * tb * max_feat * 4)
    cparams = dict(dimension_semantics=("parallel",))
    if vmem_est > 32 * 2**20:
        # raise the scoped limit (cap well under v7x's 64 MiB physical VMEM)
        cparams["vmem_limit_bytes"] = int(min(2 * vmem_est, 56 * 2**20))

    kernel = functools.partial(
        _mlp_kernel,
        slope=float(leaky_relu_slope),
        num_weights=num_weights,
        compute_dtype=dtype,
    )

    out_padded = pl.pallas_call(
        kernel,
        out_shape=jax.ShapeDtypeStruct((batch_p, out_p), dtype),
        grid=grid,
        in_specs=in_specs,
        out_specs=out_specs,
        compiler_params=pltpu.CompilerParams(**cparams),
        cost_estimate=cost,
    )(x_pad, *padded_weights)

    return out_padded[:batch, :out_dim]


def init_mlp_params(key, input_dim, hidden_dim, output_dim, num_layers,
                    dtype=jnp.float32):
    """Deterministic init matching PyTorch nn.Linear default:
    U(-1/sqrt(fan_in), 1/sqrt(fan_in)).  Stored as [in, out]."""
    dims = []
    for l in range(num_layers):
        dims.append((input_dim if l == 0 else hidden_dim, hidden_dim))
    dims.append((hidden_dim, output_dim))

    weights = []
    for (fan_in, fan_out) in dims:
        key, sub = jax.random.split(key)
        bound = 1.0 / (fan_in ** 0.5)
        w = jax.random.uniform(sub, (fan_in, fan_out),
                               minval=-bound, maxval=bound, dtype=dtype)
        weights.append(w)
    return weights


def mlp_reference(x, weights, slope=0.2):
    """Pure-JAX reference for correctness checking."""
    h = x
    for i, w in enumerate(weights):
        h = h @ w
        if i < len(weights) - 1:
            h = jnp.where(h >= 0, h, slope * h)
    return h


if __name__ == "__main__":
    batch = 8
    input_dim = 16
    hidden_dim = 32
    output_dim = 8
    num_layers = 3
    slope = 0.2

    key = jax.random.PRNGKey(0)
    key, xkey = jax.random.split(key)
    x = jax.random.normal(xkey, (batch, input_dim), dtype=jnp.float32)
    weights = init_mlp_params(key, input_dim, hidden_dim, output_dim,
                              num_layers)

    out = mlp_forward(x, weights, leaky_relu_slope=slope)
    out = jax.block_until_ready(out)
    ref = mlp_reference(x, weights, slope=slope)
    assert out.shape == (batch, output_dim)
    # tolerance covers TPU MXU default-precision f32 matmuls
    assert jnp.allclose(out, ref, atol=2e-2, rtol=2e-2), "mismatch vs reference"

    # second check: batch not a multiple of the tile -> exercises batch padding
    key, xkey2 = jax.random.split(key)
    x2 = jax.random.normal(xkey2, (260, input_dim), dtype=jnp.float32)
    out2 = jax.block_until_ready(mlp_forward(x2, weights,
                                             leaky_relu_slope=slope))
    ref2 = mlp_reference(x2, weights, slope=slope)
    assert out2.shape == (260, output_dim)
    assert jnp.allclose(out2, ref2, atol=2e-2, rtol=2e-2), "mismatch (tiled)"

    print("KERNEL_OK")
</pallas_src>

<mosaic_0001>
module attributes {stable_mosaic.version = 11 : i64} {
  func.func @_mlp_kernel(%arg0: i32, %arg1: memref<8x128xf32, #tpu.memory_space<vmem>>, %arg2: memref<128x128xf32, #tpu.memory_space<vmem>>, %arg3: memref<128x128xf32, #tpu.memory_space<vmem>>, %arg4: memref<128x128xf32, #tpu.memory_space<vmem>>, %arg5: memref<128x128xf32, #tpu.memory_space<vmem>>, %arg6: memref<8x128xf32, #tpu.memory_space<vmem>>) attributes {dimension_semantics = [#tpu.dimension_semantics<parallel>], iteration_bounds = array<i64: 1>, scalar_prefetch = 0 : i64, scratch_operands = 0 : i64, tpu.core_type = #tpu.core_type<tc>, window_params = [{transform_indices = @transform_0, window_bounds = array<i64: 8, 128>}, {pipeline_mode = #tpu.pipeline_mode<synchronous>, transform_indices = @transform_1, window_bounds = array<i64: 128, 128>}, {pipeline_mode = #tpu.pipeline_mode<synchronous>, transform_indices = @transform_2, window_bounds = array<i64: 128, 128>}, {pipeline_mode = #tpu.pipeline_mode<synchronous>, transform_indices = @transform_3, window_bounds = array<i64: 128, 128>}, {pipeline_mode = #tpu.pipeline_mode<synchronous>, transform_indices = @transform_4, window_bounds = array<i64: 128, 128>}, {transform_indices = @transform_5, window_bounds = array<i64: 8, 128>}]} {
    %c0 = arith.constant 0 : index
    %c0_0 = arith.constant 0 : index
    %0 = vector.load %arg1[%c0, %c0_0] : memref<8x128xf32, #tpu.memory_space<vmem>>, vector<8x128xf32>
    %c0_1 = arith.constant 0 : index
    %c0_2 = arith.constant 0 : index
    %1 = vector.load %arg2[%c0_1, %c0_2] : memref<128x128xf32, #tpu.memory_space<vmem>>, vector<128x128xf32>
    %cst = arith.constant dense<0.000000e+00> : vector<8x128xf32>
    %2 = tpu.matmul %0, %1, %cst {dimension_numbers = #tpu.dot_dimension_numbers<[1], [0], [0], [1], [0, 0, 1, 1], [], []>} : vector<8x128xf32>, vector<128x128xf32>, vector<8x128xf32> -> vector<8x128xf32>
    %cst_3 = arith.constant 2.000000e-01 : f32
    %3 = vector.broadcast %cst_3 : f32 to vector<8x128xf32>
    %4 = arith.mulf %3, %2 : vector<8x128xf32>
    %5 = arith.maximumf %2, %4 : vector<8x128xf32>
    %c0_4 = arith.constant 0 : index
    %c0_5 = arith.constant 0 : index
    %6 = vector.load %arg3[%c0_4, %c0_5] : memref<128x128xf32, #tpu.memory_space<vmem>>, vector<128x128xf32>
    %cst_6 = arith.constant dense<0.000000e+00> : vector<8x128xf32>
    %7 = tpu.matmul %5, %6, %cst_6 {dimension_numbers = #tpu.dot_dimension_numbers<[1], [0], [0], [1], [0, 0, 1, 1], [], []>} : vector<8x128xf32>, vector<128x128xf32>, vector<8x128xf32> -> vector<8x128xf32>
    %cst_7 = arith.constant 2.000000e-01 : f32
    %8 = vector.broadcast %cst_7 : f32 to vector<8x128xf32>
    %9 = arith.mulf %8, %7 : vector<8x128xf32>
    %10 = arith.maximumf %7, %9 : vector<8x128xf32>
    %c0_8 = arith.constant 0 : index
    %c0_9 = arith.constant 0 : index
    %11 = vector.load %arg4[%c0_8, %c0_9] : memref<128x128xf32, #tpu.memory_space<vmem>>, vector<128x128xf32>
    %cst_10 = arith.constant dense<0.000000e+00> : vector<8x128xf32>
    %12 = tpu.matmul %10, %11, %cst_10 {dimension_numbers = #tpu.dot_dimension_numbers<[1], [0], [0], [1], [0, 0, 1, 1], [], []>} : vector<8x128xf32>, vector<128x128xf32>, vector<8x128xf32> -> vector<8x128xf32>
    %cst_11 = arith.constant 2.000000e-01 : f32
    %13 = vector.broadcast %cst_11 : f32 to vector<8x128xf32>
    %14 = arith.mulf %13, %12 : vector<8x128xf32>
    %15 = arith.maximumf %12, %14 : vector<8x128xf32>
    %c0_12 = arith.constant 0 : index
    %c0_13 = arith.constant 0 : index
    %16 = vector.load %arg5[%c0_12, %c0_13] : memref<128x128xf32, #tpu.memory_space<vmem>>, vector<128x128xf32>
    %cst_14 = arith.constant dense<0.000000e+00> : vector<8x128xf32>
    %17 = tpu.matmul %15, %16, %cst_14 {dimension_numbers = #tpu.dot_dimension_numbers<[1], [0], [0], [1], [0, 0, 1, 1], [], []>} : vector<8x128xf32>, vector<128x128xf32>, vector<8x128xf32> -> vector<8x128xf32>
    %c0_15 = arith.constant 0 : index
    %c0_16 = arith.constant 0 : index
    %18 = vector.load %arg6[%c0_15, %c0_16] : memref<8x128xf32, #tpu.memory_space<vmem>>, vector<8x128xf32>
    tpu.vector_store %arg6[%c0_15, %c0_16], %17 {strides = array<i32>} : memref<8x128xf32, #tpu.memory_space<vmem>>, vector<8x128xf32>,
    return
  }
  func.func @transform_0(%arg0: i32) -> (i32, i32) {
    %c0_i32 = arith.constant 0 : i32
    %c0_i32_0 = arith.constant 0 : i32
    return %arg0, %c0_i32 : i32, i32
  }
  func.func @transform_1(%arg0: i32) -> (i32, i32) {
    %c0_i32 = arith.constant 0 : i32
    %c0_i32_0 = arith.constant 0 : i32
    %c0_i32_1 = arith.constant 0 : i32
    return %c0_i32, %c0_i32_0 : i32, i32
  }
  func.func @transform_2(%arg0: i32) -> (i32, i32) {
    %c0_i32 = arith.constant 0 : i32
    %c0_i32_0 = arith.constant 0 : i32
    %c0_i32_1 = arith.constant 0 : i32
    return %c0_i32, %c0_i32_0 : i32, i32
  }
  func.func @transform_3(%arg0: i32) -> (i32, i32) {
    %c0_i32 = arith.constant 0 : i32
    %c0_i32_0 = arith.constant 0 : i32
    %c0_i32_1 = arith.constant 0 : i32
    return %c0_i32, %c0_i32_0 : i32, i32
  }
  func.func @transform_4(%arg0: i32) -> (i32, i32) {
    %c0_i32 = arith.constant 0 : i32
    %c0_i32_0 = arith.constant 0 : i32
    %c0_i32_1 = arith.constant 0 : i32
    return %c0_i32, %c0_i32_0 : i32, i32
  }
  func.func @transform_5(%arg0: i32) -> (i32, i32) {
    %c0_i32 = arith.constant 0 : i32
    %c0_i32_0 = arith.constant 0 : i32
    return %arg0, %c0_i32 : i32, i32
  }
}

</mosaic_0001>

<bundles_post_ra>
// kernel: tpu_custom_call.1
= control target key start
LH: loop header
LB: loop body
LE: loop exit
PB: predicated region body
PF: predicated region fallthrough
CT: control target
= control target key end

     0   :  { %10 = vsyncpa [#allocation3], 0  ;;  %s1076_s0 = inlined_call_operand.hbm [shape: f32[8,128], index: 0, kind: input, shape index: {}]   ;;  %s1077_s1 = inlined_call_operand.hbm [shape: f32[128,128], index: 1, kind: input, shape index: {}]   ;;  %s1078_s2 = inlined_call_operand.hbm [shape: f32[128,128], index: 2, kind: input, shape index: {}]   ;;  %s1079_s3 = inlined_call_operand.hbm [shape: f32[128,128], index: 3, kind: input, shape index: {}]   ;;  %s1080_s4 = inlined_call_operand.hbm [shape: f32[128,128], index: 4, kind: input, shape index: {}]   ;;  %s1081_s5 = inlined_call_operand.hbm [shape: f32[8,128], index: 5, kind: output, shape index: {}]  }
   0x1   :  { %11 = vsyncpa [#allocation6], 0 }
   0x2   :  { %12 = vsyncpa [#allocation9], 0 }
   0x3   :  { %13 = vsyncpa [#allocation4], 0  ;;  %s911_s18 = smov [#allocation5]   ;;  %s771_s22 = scalar_lea.hbm %s1077_s1, 2048 }
   0x4   :  { %s29_s19 = sshll.u32 %s911_s18, 4  ;;  %p772_p0 = scmp.ne.s32.totalorder %s1077_s1, %s771_s22  ;;  %s30_s19 = int_to_ptr.vmem [resolvable:$true] %s29_s19 }
   0x5   :  { %p775_p1 = scmp.lt.u32.totalorder %s771_s22, %s1077_s1 }
   0x7   :  { %p777_p2 = pnand %p775_p1, %p772_p0 }
   0x9   :  { %780 = shalt.err (!%p777_p2)
}
   0xa   :  { %s781_s27 = scalar_lea.vmem %s30_s19, 2048  ;;  %p786_p4 = scmp.lt.s32.totalorder %s30_s19, %s30_s19 }
   0xb   :  { %p782_p3 = scmp.ne.s32.totalorder %s30_s19, %s781_s27  ;;  %p787_p5 = scmp.lt.s32.totalorder %s781_s27, %s781_s27 }
   0xd   :  { %p788_p6 = por %p787_p5, %p786_p4 }
   0xf   :  { %p789_p7 = pnand %p788_p6, %p782_p3 }
  0x11   :  { %792 = shalt.err (!%p789_p7)
}
  0x12   :  { %s912_s28 = smov 128   ;;  %s913_s29 = smov 8  }
  0x13   :  { %35 = dma.hbm_to_vmem [thread:$0]  %s1077_s1, 2048, %s30_s19, [#allocation6], %s912_s28, %s912_s28, %s913_s29  }
  0x14   :  { %s914_s7 = smov [#allocation8]   ;;  %s915_s9 = smov [#allocation2]  }
  0x15   :  { %s53_s8 = sshll.u32 %s914_s7, 4  ;;  %s20_s10 = sshll.u32 %s915_s9, 4  ;;  %s54_s8 = int_to_ptr.vmem [resolvable:$true] %s53_s8  ;;  %s21_s10 = int_to_ptr.vmem [resolvable:$true] %s20_s10 }
  0x16   :  { %s793_s13 = scalar_lea.hbm %s1079_s3, 2048 }
  0x17   :  { %p794_p8 = scmp.ne.s32.totalorder %s1079_s3, %s793_s13  ;;  %p797_p9 = scmp.lt.u32.totalorder %s793_s13, %s1079_s3 }
  0x19   :  { %p799_p10 = pnand %p797_p9, %p794_p8 }
  0x1b   :  { %802 = shalt.err (!%p799_p10)
}
  0x1c   :  { %s803_s1 = scalar_lea.vmem %s54_s8, 2048  ;;  %p808_p12 = scmp.lt.s32.totalorder %s54_s8, %s54_s8 }
  0x1d   :  { %p804_p11 = scmp.ne.s32.totalorder %s54_s8, %s803_s1  ;;  %p809_p13 = scmp.lt.s32.totalorder %s803_s1, %s803_s1 }
  0x1f   :  { %p810_p0 = por %p809_p13, %p808_p12 }
  0x21   :  { %p811_p1 = pnand %p810_p0, %p804_p11 }
  0x23   :  { %814 = shalt.err (!%p811_p1)
}
  0x24   :  { %59 = dma.hbm_to_vmem [thread:$0]  %s1079_s3, 2048, %s54_s8, [#allocation9], %s912_s28, %s912_s28, %s913_s29  }
  0x25   :  { %s815_s22 = scalar_lea.hbm %s1076_s0, 128 }
  0x26   :  { %p816_p2 = scmp.ne.s32.totalorder %s1076_s0, %s815_s22  ;;  %p819_p3 = scmp.lt.u32.totalorder %s815_s22, %s1076_s0 }
  0x28   :  { %p821_p4 = pnand %p819_p3, %p816_p2 }
  0x2a   :  { %824 = shalt.err (!%p821_p4)
}
  0x2b   :  { %s825_s27 = scalar_lea.vmem %s21_s10, 128  ;;  %p830_p6 = scmp.lt.s32.totalorder %s21_s10, %s21_s10 }
  0x2c   :  { %p826_p5 = scmp.ne.s32.totalorder %s21_s10, %s825_s27  ;;  %p831_p7 = scmp.lt.s32.totalorder %s825_s27, %s825_s27 }
  0x2e   :  { %p832_p8 = por %p831_p7, %p830_p6 }
  0x30   :  { %p833_p9 = pnand %p832_p8, %p826_p5 }
  0x32   :  { %836 = shalt.err (!%p833_p9)
}
  0x33   :  { %23 = dma.hbm_to_vmem [thread:$0]  %s1076_s0, 128, %s21_s10, [#allocation3]  }
  0x34   :  { %s916_s6 = smov [#allocation7]   ;;  %s917_s8 = smov [#allocation10]  }
  0x35   :  { %s41_s7 = sshll.u32 %s916_s6, 4  ;;  %s65_s9 = sshll.u32 %s917_s8, 4  ;;  %s42_s7 = int_to_ptr.vmem [resolvable:$true] %s41_s7  ;;  %s66_s9 = int_to_ptr.vmem [resolvable:$true] %s65_s9 }
  0x36   :  { %s837_s13 = scalar_lea.hbm %s1078_s2, 2048 }
  0x37   :  { %p838_p10 = scmp.ne.s32.totalorder %s1078_s2, %s837_s13  ;;  %p841_p11 = scmp.lt.u32.totalorder %s837_s13, %s1078_s2 }
  0x39   :  { %p843_p12 = pnand %p841_p11, %p838_p10 }
  0x3b   :  { %846 = shalt.err (!%p843_p12)
}
  0x3c   :  { %s847_s0 = scalar_lea.vmem %s42_s7, 2048  ;;  %p852_p0 = scmp.lt.s32.totalorder %s42_s7, %s42_s7 }
  0x3d   :  { %p848_p13 = scmp.ne.s32.totalorder %s42_s7, %s847_s0  ;;  %p853_p1 = scmp.lt.s32.totalorder %s847_s0, %s847_s0 }
  0x3f   :  { %p854_p2 = por %p853_p1, %p852_p0 }
  0x41   :  { %p855_p3 = pnand %p854_p2, %p848_p13 }
  0x43   :  { %858 = shalt.err (!%p855_p3)
}
  0x44   :  { %47 = dma.hbm_to_vmem [thread:$0]  %s1078_s2, 2048, %s42_s7, [#allocation6], %s912_s28, %s912_s28, %s913_s29  }
  0x45   :  { %s859_s20 = scalar_lea.hbm %s1080_s4, 2048 }
  0x46   :  { %p860_p4 = scmp.ne.s32.totalorder %s1080_s4, %s859_s20  ;;  %p863_p5 = scmp.lt.u32.totalorder %s859_s20, %s1080_s4 }
  0x48   :  { %p865_p6 = pnand %p863_p5, %p860_p4 }
  0x4a   :  { %868 = shalt.err (!%p865_p6)
}
  0x4b   :  { %s869_s25 = scalar_lea.vmem %s66_s9, 2048  ;;  %p874_p8 = scmp.lt.s32.totalorder %s66_s9, %s66_s9 }
  0x4c   :  { %p870_p7 = scmp.ne.s32.totalorder %s66_s9, %s869_s25  ;;  %p875_p9 = scmp.lt.s32.totalorder %s869_s25, %s869_s25 }
  0x4e   :  { %p876_p10 = por %p875_p9, %p874_p8 }
  0x50   :  { %p877_p11 = pnand %p876_p10, %p870_p7 }
  0x52   :  { %880 = shalt.err (!%p877_p11)
}
  0x53   :  { %71 = dma.hbm_to_vmem [thread:$0]  %s1080_s4, 2048, %s66_s9, [#allocation9], %s912_s28, %s912_s28, %s913_s29  }
  0x54   :  { %903 = dma.done.wait [#allocation3], 128  }
  0x55   :  { %904 = vsyncadd [#allocation3], 4294967168 }
  0x56   :  { %905 = dma.done.wait [#allocation6], 4096  }
  0x57   :  { %906 = vsyncadd [#allocation6], 4294963200 }
  0x58   :  { %907 = dma.done.wait [#allocation9], 4096  }
  0x59   :  { %908 = vsyncadd [#allocation9], 4294963200  ;;  %v918_v0 = vmov 0.0|0.0   ;;  %vm919_vm0 = vmmov 0   ;;  %v920_v1 = vmov 0.0   ;;  %v88_v2 = vld [vmem:[#allocation5] sm:$0xff] }
  0x5a   :  { %664 = vmatprep.subr.bf16.mxu0 %v918_v0  ;;  %556 = vmatprep.mubr.msk.f32.mxu0 %vm919_vm0, %v920_v1  ;;  %v89_v3 = vld [vmem:[#allocation5 + $0x8] sm:$0xff]  ;;  %v90_v4 = vld [vmem:[#allocation5 + $0x10] sm:$0xff]  ;;  %v91_v6 = vld [vmem:[#allocation5 + $0x18] sm:$0xff]  ;;  %s921_s4 = smov [#allocation11]  }
  0x5b   :  { %688 = vmatprep.subr.bf16.mxu1 %v918_v0  ;;  %591 = vmatprep.mubr.msk.f32.mxu1 %vm919_vm0, %v920_v1  ;;  %v665_v5 = vpack.c.bf16 %v89_v3, %v88_v2  ;;  %v668_v7 = vpack.c.bf16 %v91_v6, %v90_v4  ;;  %v92_v8 = vld [vmem:[#allocation5 + $0x20] sm:$0xff]  ;;  %v93_v9 = vld [vmem:[#allocation5 + $0x28] sm:$0xff]  ;;  %v178_v12 = vld [vmem:[#allocation7 + $0x10] sm:$0xff]  ;;  %s445_s28 = sshll.u32 %s921_s4, 4  ;;  %s446_s28 = int_to_ptr.vmem [resolvable:$true] %s445_s28 }
  0x5c   :  { %v176_v10 = vld [vmem:[#allocation7] sm:$0xff]  ;;  %v177_v11 = vld [vmem:[#allocation7 + $0x8] sm:$0xff]  ;;  %v179_v13 = vld [vmem:[#allocation7 + $0x18] sm:$0xff]  ;;  %v671_v14 = vpack.c.bf16 %v93_v9, %v92_v8  ;;  %s881_s29 = scalar_lea.vmem %s446_s28, 128  ;;  %p886_p13 = scmp.lt.s32.totalorder %s446_s28, %s446_s28 }
  0x5d   :  { %666 = vmatpush3.bf16.msra.mxu0 %v665_v5  ;;  %v689_v15 = vpack.c.bf16 %v177_v11, %v176_v10  ;;  %v94_v16 = vld [vmem:[#allocation5 + $0x30] sm:$0xff]  ;;  %v95_v17 = vld [vmem:[#allocation5 + $0x38] sm:$0xff]  ;;  %v692_v18 = vpack.c.bf16 %v179_v13, %v178_v12  ;;  %v180_v19 = vld [vmem:[#allocation7 + $0x20] sm:$0xff]  ;;  %p882_p12 = scmp.ne.s32.totalorder %s446_s28, %s881_s29  ;;  %p887_p0 = scmp.lt.s32.totalorder %s881_s29, %s881_s29 }
  0x5e   :  { %667 = vmatprep.subr.bf16.mxu0 %v918_v0  ;;  %v181_v20 = vld [vmem:[#allocation7 + $0x28] sm:$0xff]  ;;  %v674_v21 = vpack.c.bf16 %v95_v17, %v94_v16  ;;  %v96_v22 = vld [vmem:[#allocation5 + $0x40] sm:$0xff]  ;;  %v182_v25 = vld [vmem:[#allocation7 + $0x30] sm:$0xff] }
  0x5f   :  { %690 = vmatpush3.bf16.msra.mxu1 %v689_v15  ;;  %v97_v23 = vld [vmem:[#allocation5 + $0x48] sm:$0xff]  ;;  %v695_v24 = vpack.c.bf16 %v181_v20, %v180_v19  ;;  %v183_v26 = vld [vmem:[#allocation7 + $0x38] sm:$0xff]  ;;  %v98_v28 = vld [vmem:[#allocation5 + $0x50] sm:$0xff]  ;;  %p888_p1 = por %p887_p0, %p886_p13 }
  0x60   :  { %691 = vmatprep.subr.bf16.mxu1 %v918_v0  ;;  %v677_v27 = vpack.c.bf16 %v97_v23, %v96_v22  ;;  %v99_v29 = vld [vmem:[#allocation5 + $0x58] sm:$0xff]  ;;  %v698_v30 = vpack.c.bf16 %v183_v26, %v182_v25  ;;  %v184_v31 = vld [vmem:[#allocation7 + $0x40] sm:$0xff]  ;;  %v185_v32 = vld [vmem:[#allocation7 + $0x48] sm:$0xff] }
  0x61   :  { %669 = vmatpush3.bf16.msra.mxu0 %v668_v7  ;;  %v680_v33 = vpack.c.bf16 %v99_v29, %v98_v28  ;;  %v100_v34 = vld [vmem:[#allocation5 + $0x60] sm:$0xff]  ;;  %v101_v35 = vld [vmem:[#allocation5 + $0x68] sm:$0xff]  ;;  %v701_v36 = vpack.c.bf16 %v185_v32, %v184_v31  ;;  %v186_v37 = vld [vmem:[#allocation7 + $0x50] sm:$0xff]  ;;  %p889_p2 = pnand %p888_p1, %p882_p12 }
  0x62   :  { %670 = vmatprep.subr.bf16.mxu0 %v918_v0  ;;  %v187_v38 = vld [vmem:[#allocation7 + $0x58] sm:$0xff]  ;;  %v683_v39 = vpack.c.bf16 %v101_v35, %v100_v34  ;;  %v102_v40 = vld [vmem:[#allocation5 + $0x70] sm:$0xff]  ;;  %v188_v43 = vld [vmem:[#allocation7 + $0x60] sm:$0xff] }
  0x63   :  { %693 = vmatpush3.bf16.msra.mxu1 %v692_v18  ;;  %v103_v41 = vld [vmem:[#allocation5 + $0x78] sm:$0xff]  ;;  %v704_v42 = vpack.c.bf16 %v187_v38, %v186_v37  ;;  %v189_v44 = vld [vmem:[#allocation7 + $0x68] sm:$0xff]  ;;  %v190_v48 = vld [vmem:[#allocation7 + $0x70] sm:$0xff] }
  0x64   :  { %694 = vmatprep.subr.bf16.mxu1 %v918_v0  ;;  %v686_v45 = vpack.c.bf16 %v103_v41, %v102_v40  ;;  %v707_v46 = vpack.c.bf16 %v189_v44, %v188_v43  ;;  %v87_v47 = vld [vmem:[#allocation2] sm:$0xff]  ;;  %v264_v51 = vld [vmem:[#allocation8] sm:$0xff]  ;;  %v265_v52 = vld [vmem:[#allocation8 + $0x8] sm:$0xff] }
  0x65   :  { %672 = vmatpush3.bf16.msra.mxu0 %v671_v14  ;;  %v191_v49 = vld [vmem:[#allocation7 + $0x78] sm:$0xff]  ;;  %v266_v53 = vld [vmem:[#allocation8 + $0x10] sm:$0xff]  ;;  %v713_v54 = vpack.c.bf16 %v265_v52, %v264_v51  ;;  %v268_v57 = vld [vmem:[#allocation8 + $0x20] sm:$0xff] }
  0x66   :  { %673 = vmatprep.subr.bf16.mxu0 %v918_v0  ;;  %v710_v50 = vpack.c.bf16 %v191_v49, %v190_v48  ;;  %v267_v55 = vld [vmem:[#allocation8 + $0x18] sm:$0xff]  ;;  %v269_v58 = vld [vmem:[#allocation8 + $0x28] sm:$0xff]  ;;  %v270_v60 = vld [vmem:[#allocation8 + $0x30] sm:$0xff] }
  0x67   :  { %696 = vmatpush3.bf16.msra.mxu1 %v695_v24  ;;  %v716_v56 = vpack.c.bf16 %v267_v55, %v266_v53  ;;  %v719_v59 = vpack.c.bf16 %v269_v58, %v268_v57  ;;  %v271_v61 = vld [vmem:[#allocation8 + $0x38] sm:$0xff]  ;;  %v272_v63 = vld [vmem:[#allocation8 + $0x40] sm:$0xff]  ;;  %v273_v2 = vld [vmem:[#allocation8 + $0x48] sm:$0xff] }
  0x68   :  { %697 = vmatprep.subr.bf16.mxu1 %v918_v0  ;;  %v722_v62 = vpack.c.bf16 %v271_v61, %v270_v60  ;;  %v725_v3 = vpack.c.bf16 %v273_v2, %v272_v63  ;;  %v274_v4 = vld [vmem:[#allocation8 + $0x50] sm:$0xff]  ;;  %v275_v5 = vld [vmem:[#allocation8 + $0x58] sm:$0xff]  ;;  %v276_v7 = vld [vmem:[#allocation8 + $0x60] sm:$0xff] }
  0x69   :  { %675 = vmatpush3.bf16.msra.mxu0 %v674_v21  ;;  %v728_v6 = vpack.c.bf16 %v275_v5, %v274_v4  ;;  %v277_v8 = vld [vmem:[#allocation8 + $0x68] sm:$0xff]  ;;  %v278_v14 = vld [vmem:[#allocation8 + $0x70] sm:$0xff]  ;;  %v279_v15 = vld [vmem:[#allocation8 + $0x78] sm:$0xff] }
  0x6a   :  { %676 = vmatprep.subr.bf16.mxu0 %v918_v0  ;;  %v731_v9 = vpack.c.bf16 %v277_v8, %v276_v7  ;;  %v734_v16 = vpack.c.bf16 %v279_v15, %v278_v14  ;;  %v352_v17 = vld [vmem:[#allocation10] sm:$0xff]  ;;  %v353_v18 = vld [vmem:[#allocation10 + $0x8] sm:$0xff]  ;;  %v354_v19 = vld [vmem:[#allocation10 + $0x10] sm:$0xff] }
  0x6b   :  { %699 = vmatpush3.bf16.msra.mxu1 %v698_v30  ;;  %v737_v20 = vpack.c.bf16 %v353_v18, %v352_v17  ;;  %v355_v21 = vld [vmem:[#allocation10 + $0x18] sm:$0xff]  ;;  %v356_v23 = vld [vmem:[#allocation10 + $0x20] sm:$0xff]  ;;  %v357_v24 = vld [vmem:[#allocation10 + $0x28] sm:$0xff] }
  0x6c   :  { %700 = vmatprep.subr.bf16.mxu1 %v918_v0  ;;  %v740_v22 = vpack.c.bf16 %v355_v21, %v354_v19  ;;  %v743_v25 = vpack.c.bf16 %v357_v24, %v356_v23  ;;  %v359_v26 = vld [vmem:[#allocation10 + $0x38] sm:$0xff]  ;;  %v360_v28 = vld [vmem:[#allocation10 + $0x40] sm:$0xff]  ;;  %v361_v29 = vld [vmem:[#allocation10 + $0x48] sm:$0xff] }
  0x6d   :  { %678 = vmatpush3.bf16.msra.mxu0 %v677_v27  ;;  %v749_v30 = vpack.c.bf16 %v361_v29, %v360_v28  ;;  %v362_v31 = vld [vmem:[#allocation10 + $0x50] sm:$0xff]  ;;  %v363_v32 = vld [vmem:[#allocation10 + $0x58] sm:$0xff]  ;;  %v364_v34 = vld [vmem:[#allocation10 + $0x60] sm:$0xff] }
  0x6e   :  { %679 = vmatprep.subr.bf16.mxu0 %v918_v0  ;;  %v365_v35 = vld [vmem:[#allocation10 + $0x68] sm:$0xff]  ;;  %v366_v41 = vld [vmem:[#allocation10 + $0x70] sm:$0xff] }
  0x6f   :  { %702 = vmatpush3.bf16.msra.mxu1 %v701_v36  ;;  %v755_v36 = vpack.c.bf16 %v365_v35, %v364_v34 }
  0x70   :  { %703 = vmatprep.subr.bf16.mxu1 %v918_v0 }
  0x71   :  { %681 = vmatpush3.bf16.msra.mxu0 %v680_v33  ;;  %v752_v33 = vpack.c.bf16 %v363_v32, %v362_v31 }
  0x72   :  { %682 = vmatprep.subr.bf16.mxu0 %v918_v0 }
  0x73   :  { %705 = vmatpush3.bf16.msra.mxu1 %v704_v42  ;;  %v367_v42 = vld [vmem:[#allocation10 + $0x78] sm:$0xff] }
  0x74   :  { %706 = vmatprep.subr.bf16.mxu1 %v918_v0  ;;  %v758_v43 = vpack.c.bf16 %v367_v42, %v366_v41 }
  0x75   :  { %684 = vmatpush3.bf16.msra.mxu0 %v683_v39 }
  0x76   :  { %685 = vmatprep.subr.bf16.mxu0 %v918_v0 }
  0x77   :  { %708 = vmatpush3.bf16.msra.mxu1 %v707_v46 }
  0x78   :  { %709 = vmatprep.subr.bf16.mxu1 %v918_v0 }
  0x79   :  { %687 = vmatpush3.bf16.msra.mxu0 %v686_v45 }
  0x7a   :  { %712 = vmatprep.subr.bf16.mxu0 %v918_v0 }
  0x7b   :  { %711 = vmatpush3.bf16.msra.mxu1 %v710_v50 }
  0x7c   :  { %557 = vmatmul.mubr.f32.vlgmr.msra.gmra.mrb[0].mxu0 %v87_v47  ;;  %736 = vmatprep.subr.bf16.mxu1 %v918_v0 }
  0x7d   :  { %626 = vmatprep.mubr.msk.f32.mxu0 %vm919_vm0, %v920_v1  ;;  %714 = vmatpush3.bf16.msra.mxu0 %v713_v54 }
  0x7e   :  { %715 = vmatprep.subr.bf16.mxu0 %v918_v0 }
  0x81   :  { %717 = vmatpush3.bf16.msra.mxu0 %v716_v56 }
  0x82   :  { %718 = vmatprep.subr.bf16.mxu0 %v918_v0 }
  0x85   :  { %720 = vmatpush3.bf16.msra.mxu0 %v719_v59 }
  0x86   :  { %721 = vmatprep.subr.bf16.mxu0 %v918_v0 }
  0x89   :  { %723 = vmatpush3.bf16.msra.mxu0 %v722_v62 }
  0x8a   :  { %724 = vmatprep.subr.bf16.mxu0 %v918_v0 }
  0x8d   :  { %726 = vmatpush3.bf16.msra.mxu0 %v725_v3 }
  0x8e   :  { %727 = vmatprep.subr.bf16.mxu0 %v918_v0 }
  0x91   :  { %729 = vmatpush3.bf16.msra.mxu0 %v728_v6 }
  0x92   :  { %730 = vmatprep.subr.bf16.mxu0 %v918_v0 }
  0x95   :  { %732 = vmatpush3.bf16.msra.mxu0 %v731_v9 }
  0x96   :  { %733 = vmatprep.subr.bf16.mxu0 %v918_v0 }
  0x99   :  { %735 = vmatpush3.bf16.msra.mxu0 %v734_v16 }
 0x14f   :  { %v170_v10 = vpop.f32.mrb[0].mxu0 }
 0x150   :  { %v174_v11 = vmul.f32 0.2, %v170_v10  ;;  %v558_v12 = vpop.f32.mrb[1].mxu0 }
 0x152   :  { %v175_v13 = vmax.f32 %v170_v10, %v174_v11 }
 0x154   :  { %592 = vmatmul.mubr.f32.vlgmr.msra.gmra.mrb[0].mxu1 %v175_v13 }
 0x155   :  { %661 = vmatprep.mubr.msk.f32.mxu1 %vm919_vm0, %v920_v1  ;;  %738 = vmatpush3.bf16.msra.mxu1 %v737_v20  ;;  %v358_v1 = vld [vmem:[#allocation10 + $0x30] sm:$0xff] }
 0x156   :  { %739 = vmatprep.subr.bf16.mxu1 %v918_v0  ;;  %v746_v27 = vpack.c.bf16 %v359_v26, %v358_v1 }
 0x159   :  { %741 = vmatpush3.bf16.msra.mxu1 %v740_v22 }
 0x15a   :  { %742 = vmatprep.subr.bf16.mxu1 %v918_v0 }
 0x15d   :  { %744 = vmatpush3.bf16.msra.mxu1 %v743_v25 }
 0x15e   :  { %745 = vmatprep.subr.bf16.mxu1 %v918_v0 }
 0x161   :  { %747 = vmatpush3.bf16.msra.mxu1 %v746_v27 }
 0x162   :  { %748 = vmatprep.subr.bf16.mxu1 %v918_v0 }
 0x165   :  { %750 = vmatpush3.bf16.msra.mxu1 %v749_v30 }
 0x166   :  { %751 = vmatprep.subr.bf16.mxu1 %v918_v0 }
 0x169   :  { %753 = vmatpush3.bf16.msra.mxu1 %v752_v33 }
 0x16a   :  { %754 = vmatprep.subr.bf16.mxu1 %v918_v0 }
 0x16d   :  { %756 = vmatpush3.bf16.msra.mxu1 %v755_v36 }
 0x16e   :  { %757 = vmatprep.subr.bf16.mxu1 %v918_v0 }
 0x171   :  { %759 = vmatpush3.bf16.msra.mxu1 %v758_v43 }
 0x227   :  { %v258_v37 = vpop.f32.mrb[0].mxu1 }
 0x228   :  { %v262_v38 = vmul.f32 0.2, %v258_v37  ;;  %v593_v39 = vpop.f32.mrb[1].mxu1 }
 0x22a   :  { %v263_v40 = vmax.f32 %v258_v37, %v262_v38 }
 0x22c   :  { %627 = vmatmul.mubr.f32.vlgmr.msra.gmra.mrb[2].mxu0 %v263_v40 }
 0x2ff   :  { %v346_v44 = vpop.f32.mrb[2].mxu0 }
 0x300   :  { %v350_v45 = vmul.f32 0.2, %v346_v44  ;;  %v628_v46 = vpop.f32.mrb[3].mxu0 }
 0x302   :  { %v351_v47 = vmax.f32 %v346_v44, %v350_v45 }
 0x304   :  { %662 = vmatmul.mubr.f32.vlgmr.msra.gmra.mrb[2].mxu1 %v351_v47 }
 0x3d7   :  { %v434_v48 = vpop.f32.mrb[2].mxu1 }
 0x3d8   :  { %438 = vst [vmem:[#allocation11] sm:$0xff] %v434_v48  ;;  %v663_v0 = vpop.f32.mrb[3].mxu1 }
 0x3d9   :  { %892 = shalt.err (!%p889_p2)
}
 0x3da   :  { %s893_s30 = scalar_lea.hbm %s1081_s5, 128 }
 0x3db   :  { %p894_p3 = scmp.ne.s32.totalorder %s1081_s5, %s893_s30  ;;  %p897_p4 = scmp.lt.u32.totalorder %s893_s30, %s1081_s5 }
 0x3dd   :  { %p899_p5 = pnand %p897_p4, %p894_p3 }
 0x3df   :  { %902 = shalt.err (!%p899_p5)
}
 0x3e0   :  { %448 = dma.vmem_to_hbm [thread:$0]  %s446_s28, 128, %s1081_s5, [#allocation4]  }
 0x3e1   :  { %909 = dma.done.wait [#allocation4], 128  }
 0x3e2   :  { %910 = vsyncadd [#allocation4], 4294967168 }
 0x3e3   :  { %452 = vsyncpa [#allocation3], 1 }
 0x3e4   :  { %453 = vsyncpa [#allocation6], 1 }
 0x3e5   :  { %454 = vsyncpa [#allocation9], 1 }
 0x3e6   :  { %455 = vsyncpa [#allocation4], 1 }

</bundles_post_ra>
